<compile_context>
chip_gen: v7x
topology: tpu7x:2x2x1
jax: 0.10.0
libtpu: 0.0.40
codegen_flags: <defaults>
</compile_context>

<pallas_src>
import functools

import jax
import jax.numpy as jnp
from jax.experimental import pallas as pl
from jax.experimental.pallas import tpu as pltpu

_NEG_FILL = -1.0e30  # padding value for padded class columns (finite, underflows exp)


def _mixup_ce_kernel(pred_ref, label_ref, label_mixed_ref, lam_ref, out_ref, acc_ref,
                     *, tile_n, n_valid):
    """One (TILE_N, C_pad) tile of the fused mixup cross-entropy reduction."""
    i = pl.program_id(0)

    @pl.when(i == 0)
    def _init():
        acc_ref[0, 0] = 0.0

    x = pred_ref[...].astype(jnp.float32)                       # (TILE_N, C_pad)

    # Numerically-stable log-sum-exp over the class (lane) axis.
    m = jnp.max(x, axis=-1, keepdims=True)                      # (TILE_N, 1)
    shifted = x - m
    lse = jnp.log(jnp.sum(jnp.exp(shifted), axis=-1, keepdims=True))  # (TILE_N, 1)

    # Single weighted one-hot mask: lam * onehot(label) + (1-lam) * onehot(label_mixed).
    lam = lam_ref[0, 0]
    cls_iota = jax.lax.broadcasted_iota(jnp.int32, x.shape, 1)  # (TILE_N, C_pad)
    w = (lam * (cls_iota == label_ref[...]).astype(jnp.float32)
         + (1.0 - lam) * (cls_iota == label_mixed_ref[...]).astype(jnp.float32))
    tgt = jnp.sum(shifted * w, axis=-1, keepdims=True)          # (TILE_N, 1)

    # Mask out padded rows of the last tile (padded labels are -1 -> w is already 0,
    # but their lse contribution must be removed too).
    row = i * tile_n + jax.lax.broadcasted_iota(jnp.int32, (tile_n, 1), 0)
    valid = (row < n_valid).astype(jnp.float32)

    acc_ref[0, 0] += jnp.sum((lse - tgt) * valid)

    @pl.when(i == pl.num_programs(0) - 1)
    def _finalize():
        out_ref[0, 0] = acc_ref[0, 0] * (1.0 / float(n_valid))  # mean over GLOBAL N


def mixup_loss(pred, label, label_mixed, lam, *, tile_n=None):
    """pred: (N, C) float logits (any float dtype, e.g. bf16/f32);
    label / label_mixed: (N,) int; lam: scalar float.  Returns scalar f32 loss."""
    n, c = pred.shape
    itemsize = jnp.dtype(pred.dtype).itemsize

    # Lane-dense class dimension.
    c_pad = ((c + 127) // 128) * 128

    # Tile size: largest multiple of 8 whose double-buffered pred block stays well
    # under the scoped-VMEM budget on every generation (v5e default 16 MiB scoped,
    # v7x 64 MiB physical), capped at 512 rows (~85% of HBM roofline per measurements).
    if tile_n is None:
        per_buf_budget = 4 * 1024 * 1024                       # bytes per pred buffer
        max_rows = max(8, (per_buf_budget // (c_pad * itemsize)) // 8 * 8)
        n8 = ((n + 7) // 8) * 8
        tile_n = int(max(8, min(512, max_rows, n8)))
    tile_n = max(8, (int(tile_n) // 8) * 8)

    n_pad = ((n + tile_n - 1) // tile_n) * tile_n
    num_tiles = n_pad // tile_n

    # Pad class columns with a large NEGATIVE value (so they vanish from the softmax
    # normalizer); pad rows with zeros (they are masked out inside the kernel).
    if c_pad > c:
        pred = jnp.pad(pred, ((0, 0), (0, c_pad - c)), constant_values=_NEG_FILL)
    if n_pad > n:
        pred = jnp.pad(pred, ((0, n_pad - n), (0, 0)))

    label2d = jnp.pad(label.astype(jnp.int32), (0, n_pad - n),
                      constant_values=-1).reshape(n_pad, 1)
    label_mixed2d = jnp.pad(label_mixed.astype(jnp.int32), (0, n_pad - n),
                            constant_values=-1).reshape(n_pad, 1)
    lam2d = jnp.asarray(lam, jnp.float32).reshape(1, 1)

    kernel = functools.partial(_mixup_ce_kernel, tile_n=tile_n, n_valid=n)

    out = pl.pallas_call(
        kernel,
        out_shape=jax.ShapeDtypeStruct((1, 1), jnp.float32),
        grid=(num_tiles,),
        in_specs=[
            pl.BlockSpec((tile_n, c_pad), lambda i: (i, 0)),              # pred tile
            pl.BlockSpec((tile_n, 1), lambda i: (i, 0)),                  # label tile
            pl.BlockSpec((tile_n, 1), lambda i: (i, 0)),                  # label_mixed tile
            pl.BlockSpec(memory_space=pltpu.MemorySpace.SMEM),            # lam scalar
        ],
        out_specs=pl.BlockSpec(memory_space=pltpu.MemorySpace.SMEM),      # scalar loss
        scratch_shapes=[pltpu.SMEM((1, 1), jnp.float32)],                 # accumulator
        compiler_params=pltpu.CompilerParams(
            dimension_semantics=("arbitrary",),       # batch axis is a reduction here
            vmem_limit_bytes=32 * 1024 * 1024,        # fits v5e/v6e/v7x scoped budgets
        ),
    )(pred, label2d, label_mixed2d, lam2d)
    return out[0, 0]


def _reference(pred, label, label_mixed, lam):
    logp = jax.nn.log_softmax(pred.astype(jnp.float32), axis=-1)
    ce_a = -jnp.mean(jnp.take_along_axis(logp, label[:, None], axis=1))
    ce_b = -jnp.mean(jnp.take_along_axis(logp, label_mixed[:, None], axis=1))
    return lam * ce_a + (1.0 - lam) * ce_b


if __name__ == "__main__":
    key = jax.random.PRNGKey(0)

    # Test 1: small f32 case (single tile, padded C 32 -> 128).
    k_pred, k_lab, k_labm, k_lam = jax.random.split(key, 4)
    N, C = 8, 32
    pred = jax.random.normal(k_pred, (N, C), dtype=jnp.float32)
    label = jax.random.randint(k_lab, (N,), 0, C, dtype=jnp.int32)
    label_mixed = jax.random.randint(k_labm, (N,), 0, C, dtype=jnp.int32)
    lam = jax.random.uniform(k_lam, (), dtype=jnp.float32)

    out = jax.block_until_ready(mixup_loss(pred, label, label_mixed, lam))
    ref = _reference(pred, label, label_mixed, lam)
    assert jnp.allclose(out, ref, atol=1e-5, rtol=1e-5), (out, ref)

    # Test 2: multi-tile f32 case with ragged last tile (N=50 not a multiple of 16)
    # and non-multiple-of-128 class count (37 -> padded to 128).
    k_pred, k_lab, k_labm, k_lam = jax.random.split(jax.random.PRNGKey(1), 4)
    N2, C2 = 50, 37
    pred2 = jax.random.normal(k_pred, (N2, C2), dtype=jnp.float32)
    label2 = jax.random.randint(k_lab, (N2,), 0, C2, dtype=jnp.int32)
    label_mixed2 = jax.random.randint(k_labm, (N2,), 0, C2, dtype=jnp.int32)
    lam2 = jax.random.uniform(k_lam, (), dtype=jnp.float32)

    out2 = jax.block_until_ready(mixup_loss(pred2, label2, label_mixed2, lam2, tile_n=16))
    ref2 = _reference(pred2, label2, label_mixed2, lam2)
    assert jnp.allclose(out2, ref2, atol=1e-5, rtol=1e-5), (out2, ref2)

    # Test 3: bf16 logits passed straight through (no wrapper-side f32 cast).
    pred3 = pred2.astype(jnp.bfloat16)
    out3 = jax.block_until_ready(mixup_loss(pred3, label2, label_mixed2, lam2))
    ref3 = _reference(pred3, label2, label_mixed2, lam2)
    assert jnp.allclose(out3, ref3, atol=1e-4, rtol=1e-4), (out3, ref3)

    print("KERNEL_OK")
</pallas_src>

<mosaic_0001>
module attributes {stable_mosaic.version = 11 : i64} {
  func.func @_mixup_ce_kernel(%arg0: i32, %arg1: memref<8x128xf32, #tpu.memory_space<vmem>>, %arg2: memref<8x1xi32, #tpu.memory_space<vmem>>, %arg3: memref<8x1xi32, #tpu.memory_space<vmem>>, %arg4: memref<1x1xf32, #tpu.memory_space<smem>>, %arg5: memref<1x1xf32, #tpu.memory_space<smem>>, %arg6: memref<1x1xf32, #tpu.memory_space<smem>>) attributes {dimension_semantics = [#tpu.dimension_semantics<arbitrary>], iteration_bounds = array<i64: 1>, scalar_prefetch = 0 : i64, scratch_operands = 1 : i64, tpu.core_type = #tpu.core_type<tc>, window_params = [{transform_indices = @transform_0, window_bounds = array<i64: 8, 128>}, {transform_indices = @transform_1, window_bounds = array<i64: 8, 1>}, {transform_indices = @transform_2, window_bounds = array<i64: 8, 1>}, {transform_indices = @transform_3, window_bounds = array<i64: 1, 1>}, {transform_indices = @transform_4, window_bounds = array<i64: 1, 1>}]} {
    %c0_i32 = arith.constant 0 : i32
    %0 = arith.cmpi eq, %arg0, %c0_i32 : i32
    %1 = arith.extui %0 : i1 to i32
    %c0_i32_0 = arith.constant 0 : i32
    %2 = arith.cmpi ne, %1, %c0_i32_0 : i32
    scf.if %2 {
      %cst_19 = arith.constant 0.000000e+00 : f32
      %c0_20 = arith.constant 0 : index
      %c0_21 = arith.constant 0 : index
      %53 = memref.load %arg6[%c0_20, %c0_21] : memref<1x1xf32, #tpu.memory_space<smem>>
      memref.store %cst_19, %arg6[%c0_20, %c0_21] : memref<1x1xf32, #tpu.memory_space<smem>>
    } else {
    }
    %c0 = arith.constant 0 : index
    %c0_1 = arith.constant 0 : index
    %3 = vector.load %arg1[%c0, %c0_1] : memref<8x128xf32, #tpu.memory_space<vmem>>, vector<8x128xf32>
    %cst = arith.constant dense<0xFF800000> : vector<8xf32>
    %4 = vector.multi_reduction <maximumf>, %3, %cst [1] : vector<8x128xf32> to vector<8xf32>
    %5 = vector.shape_cast %4 : vector<8xf32> to vector<8x1xf32>
    %6 = vector.broadcast %5 : vector<8x1xf32> to vector<8x128xf32>
    %7 = arith.subf %3, %6 : vector<8x128xf32>
    %8 = math.exp %7 : vector<8x128xf32>
    %cst_2 = arith.constant dense<0.000000e+00> : vector<8xf32>
    %9 = vector.multi_reduction <add>, %8, %cst_2 [1] : vector<8x128xf32> to vector<8xf32>
    %10 = vector.shape_cast %9 : vector<8xf32> to vector<8x1xf32>
    %11 = math.log %10 : vector<8x1xf32>
    %c0_3 = arith.constant 0 : index
    %c0_4 = arith.constant 0 : index
    %12 = memref.load %arg4[%c0_3, %c0_4] : memref<1x1xf32, #tpu.memory_space<smem>>
    %13 = tpu.iota {dimensions = array<i32: 1>} : vector<8x128xi32>
    %c0_5 = arith.constant 0 : index
    %c0_6 = arith.constant 0 : index
    %14 = vector.load %arg2[%c0_5, %c0_6] : memref<8x1xi32, #tpu.memory_space<vmem>>, vector<8x1xi32>
    %15 = vector.broadcast %14 : vector<8x1xi32> to vector<8x128xi32>
    %16 = arith.cmpi eq, %13, %15 : vector<8x128xi32>
    %17 = arith.extui %16 : vector<8x128xi1> to vector<8x128xi32>
    %18 = arith.sitofp %17 : vector<8x128xi32> to vector<8x128xf32>
    %19 = vector.broadcast %12 : f32 to vector<8x128xf32>
    %20 = arith.mulf %19, %18 : vector<8x128xf32>
    %cst_7 = arith.constant 1.000000e+00 : f32
    %21 = arith.subf %cst_7, %12 : f32
    %c0_8 = arith.constant 0 : index
    %c0_9 = arith.constant 0 : index
    %22 = vector.load %arg3[%c0_8, %c0_9] : memref<8x1xi32, #tpu.memory_space<vmem>>, vector<8x1xi32>
    %23 = vector.broadcast %22 : vector<8x1xi32> to vector<8x128xi32>
    %24 = arith.cmpi eq, %13, %23 : vector<8x128xi32>
    %25 = arith.extui %24 : vector<8x128xi1> to vector<8x128xi32>
    %26 = arith.sitofp %25 : vector<8x128xi32> to vector<8x128xf32>
    %27 = vector.broadcast %21 : f32 to vector<8x128xf32>
    %28 = arith.mulf %27, %26 : vector<8x128xf32>
    %29 = arith.addf %20, %28 : vector<8x128xf32>
    %30 = arith.mulf %7, %29 : vector<8x128xf32>
    %cst_10 = arith.constant dense<0.000000e+00> : vector<8xf32>
    %31 = vector.multi_reduction <add>, %30, %cst_10 [1] : vector<8x128xf32> to vector<8xf32>
    %32 = vector.shape_cast %31 : vector<8xf32> to vector<8x1xf32>
    %c8_i32 = arith.constant 8 : i32
    %33 = arith.muli %arg0, %c8_i32 : i32
    %34 = tpu.iota {dimensions = array<i32: 0>} : vector<8x1xi32>
    %35 = vector.broadcast %33 : i32 to vector<8x1xi32>
    %36 = arith.addi %35, %34 : vector<8x1xi32>
    %c8_i32_11 = arith.constant 8 : i32
    %37 = vector.broadcast %c8_i32_11 : i32 to vector<8x1xi32>
    %38 = arith.cmpi slt, %36, %37 : vector<8x1xi32>
    %39 = arith.extui %38 : vector<8x1xi1> to vector<8x1xi32>
    %40 = arith.sitofp %39 : vector<8x1xi32> to vector<8x1xf32>
    %c0_12 = arith.constant 0 : index
    %c0_13 = arith.constant 0 : index
    %41 = memref.load %arg6[%c0_12, %c0_13] : memref<1x1xf32, #tpu.memory_space<smem>>
    %42 = arith.subf %11, %32 : vector<8x1xf32>
    %43 = arith.mulf %42, %40 : vector<8x1xf32>
    %44 = vector.shape_cast %43 : vector<8x1xf32> to vector<1x8x1xf32>
    %cst_14 = arith.constant dense<0.000000e+00> : vector<1xf32>
    %45 = vector.multi_reduction <add>, %44, %cst_14 [1, 2] : vector<1x8x1xf32> to vector<1xf32>
    %46 = vector.shape_cast %45 : vector<1xf32> to vector<1x1x1xf32>
    %47 = vector.extract %46[0, 0, 0] : f32 from vector<1x1x1xf32>
    %48 = arith.addf %41, %47 : f32
    %c0_15 = arith.constant 0 : index
    %c0_16 = arith.constant 0 : index
    %49 = memref.load %arg6[%c0_15, %c0_16] : memref<1x1xf32, #tpu.memory_space<smem>>
    memref.store %48, %arg6[%c0_15, %c0_16] : memref<1x1xf32, #tpu.memory_space<smem>>
    %c0_i32_17 = arith.constant 0 : i32
    %50 = arith.cmpi eq, %arg0, %c0_i32_17 : i32
    %51 = arith.extui %50 : i1 to i32
    %c0_i32_18 = arith.constant 0 : i32
    %52 = arith.cmpi ne, %51, %c0_i32_18 : i32
    scf.if %52 {
      %c0_19 = arith.constant 0 : index
      %c0_20 = arith.constant 0 : index
      %53 = memref.load %arg6[%c0_19, %c0_20] : memref<1x1xf32, #tpu.memory_space<smem>>
      %cst_21 = arith.constant 1.250000e-01 : f32
      %54 = arith.mulf %53, %cst_21 : f32
      %c0_22 = arith.constant 0 : index
      %c0_23 = arith.constant 0 : index
      %55 = memref.load %arg5[%c0_22, %c0_23] : memref<1x1xf32, #tpu.memory_space<smem>>
      memref.store %54, %arg5[%c0_22, %c0_23] : memref<1x1xf32, #tpu.memory_space<smem>>
    } else {
    }
    return
  }
  func.func @transform_0(%arg0: i32) -> (i32, i32) {
    %c0_i32 = arith.constant 0 : i32
    %c0_i32_0 = arith.constant 0 : i32
    return %arg0, %c0_i32 : i32, i32
  }
  func.func @transform_1(%arg0: i32) -> (i32, i32) {
    %c0_i32 = arith.constant 0 : i32
    %c0_i32_0 = arith.constant 0 : i32
    return %arg0, %c0_i32 : i32, i32
  }
  func.func @transform_2(%arg0: i32) -> (i32, i32) {
    %c0_i32 = arith.constant 0 : i32
    %c0_i32_0 = arith.constant 0 : i32
    return %arg0, %c0_i32 : i32, i32
  }
  func.func @transform_3(%arg0: i32) -> (i32, i32) {
    %c0_i32 = arith.constant 0 : i32
    %c0_i32_0 = arith.constant 0 : i32
    %c0_i32_1 = arith.constant 0 : i32
    return %c0_i32, %c0_i32_0 : i32, i32
  }
  func.func @transform_4(%arg0: i32) -> (i32, i32) {
    %c0_i32 = arith.constant 0 : i32
    %c0_i32_0 = arith.constant 0 : i32
    %c0_i32_1 = arith.constant 0 : i32
    return %c0_i32, %c0_i32_0 : i32, i32
  }
}

</mosaic_0001>

<bundles_post_ra>
// kernel: tpu_custom_call.1
= control target key start
LH: loop header
LB: loop body
LE: loop exit
PB: predicated region body
PF: predicated region fallthrough
CT: control target
= control target key end

     0   :  { %v131_v2 = vmov 0   ;;  %s186_s0 = inlined_call_operand.vmem [shape: f32[8,128], index: 0, kind: input, shape index: {}]   ;;  %s187_s1 = inlined_call_operand.vmem [shape: s32[8,1], index: 1, kind: input, shape index: {}]   ;;  %s188_s2 = inlined_call_operand.vmem [shape: s32[8,1], index: 2, kind: input, shape index: {}]   ;;  %s189_s3 = inlined_call_operand.<no memory space> [shape: f32[1,1], index: 3, kind: input, shape index: {}]   ;;  %s190_s4 = inlined_call_operand.hbm [shape: f32[1,1], index: 4, kind: output, shape index: {}]  }
   0x1   :  { %v25_v0 = vld [vmem:[%s186_s0] sm:$0xff]  ;;  %114 = vset.pattern.permute.xlu1 %v131_v2 }
   0x2   :  { %v48_v1 = vld [vmem:[%s188_s2] sm:$0xff]  ;;  %26 = vmax.xlane.f32.xlu0 %v25_v0 }
   0x3   :  { %10 = vsyncpa [#allocation5], 0  ;;  %113 = vset.pattern.permute.xlu0 %v131_v2  ;;  %50 = vperm.xlu1 %114, %v48_v1   ;;  %v38_v3 = vld [vmem:[%s187_s1] sm:$0xff]  ;;  %v36_v4 = vlaneseq  ;;  %s47_s2 = ssub.f32 1.0, %s189_s3  ;;  %v132_v11 = vmov 0.0   ;;  %v45_v13 = vstv %s189_s3  ;;  %vm72_vm2 = vcmask 7168  }
   0x4   :  { %s119_s26 = scalar_lea.hbm %s190_s4, 16 }
   0x5   :  { %v37_v6 = vand.u32 127, %v36_v4  ;;  %v55_v10 = vstv %s47_s2  ;;  %p120_p0 = scmp.ne.s32.totalorder %s190_s4, %s119_s26  ;;  %p123_p1 = scmp.lt.u32.totalorder %s119_s26, %s190_s4 }
   0x7   :  { %p125_p2 = pnand %p123_p1, %p120_p0 }
  0x18   :  { %40 = vperm.xlu0 %113, %v38_v3  }
  0x82   :  { %v51_v8 = vpop.permute.xlu1 %50 }
  0x83   :  { %vm52_vm0 = vcmp.eq.s32.totalorder %v37_v6, %v51_v8 }
  0x84   :  { %v107_v12 = vsel %vm52_vm0, 1.0, %v132_v11 }
  0x85   :  { %v56_v15 = vmul.f32 %v107_v12, %v55_v10 }
  0x8f   :  { %v27_v5 = vpop.xlane.xlu0 %26 }
  0x90   :  { %v28_v7 = vsub.f32 %v25_v0, %v27_v5 }
  0x92   :  { %v29_v9 = vmul.f32 1.442695, %v28_v7 }
  0x94   :  { %115 = vpow2.f32 %v29_v9 }
  0x97   :  { %v41_v14 = vpop.permute.xlu0 %40 }
  0x98   :  { %vm42_vm1 = vcmp.eq.s32.totalorder %v37_v6, %v41_v14 }
  0x99   :  { %v106_v16 = vsel %vm42_vm1, 1.0, %v132_v11 }
  0x9a   :  { %v46_v17 = vmul.f32 %v106_v16, %v45_v13 }
  0x9c   :  { %v57_v18 = vadd.f32 %v56_v15, %v46_v17 }
  0x9e   :  { %v116_v19 = vpop.eup %115  ;;  %v58_v20 = vmul.f32 %v57_v18, %v28_v7 }
  0x9f   :  { %31 = vadd.xlane.f32.xlu1 %v116_v19 }
  0xa3   :  { %59 = vadd.xlane.f32.xlu1 %v58_v20 }
 0x12c   :  { %v32_v21 = vpop.xlane.xlu1 %31 }
 0x12d   :  { %117 = vlog2.f32 %v32_v21 }
 0x130   :  { %v60_v24 = vpop.xlane.xlu1 %59 }
 0x137   :  { %v118_v22 = vpop.eup %117 }
 0x138   :  { %v34_v23 = vmul.f32 0.6931472, %v118_v22 }
 0x13a   :  { %v70_v25 = vsub.f32 %v34_v23, %v60_v24 }
 0x13c   :  { %v73_v26 = vsel %vm72_vm2, %v70_v25, 0.0 }
 0x13d   :  { %74 = vadd.xlane.f32.xlu1 %v73_v26 }
 0x1ca   :  { %v75_v27 = vpop.xlane.xlu1 %74 }
 0x1cb   :  { %v76_v28 = vrot.slane %v75_v27, 4 }
 0x1cd   :  { %v77_v29 = vadd.f32 %v76_v28, %v75_v27 }
 0x1cf   :  { %v78_v30 = vrot.slane %v77_v29, 2 }
 0x1d1   :  { %v79_v31 = vadd.f32 %v78_v30, %v77_v29 }
 0x1d3   :  { %v80_v32 = vrot.slane %v79_v31, 1 }
 0x1d5   :  { %v81_v33 = vadd.f32 %v80_v32, %v79_v31 }
 0x1d7   :  { %108 = vpush %v81_v33 }
 0x208   :  { %s109_s1 = spop %108 }
 0x209   :  { %s90_s3 = smul.f32 0.125, %s109_s1 }
 0x20b   :  { %92 = sst [smem:[#allocation4]] %s90_s3 }
 0x20c   :  { %128 = shalt.err (!%p125_p2)
}
 0x20d   :  { %s133_s5 = smov [#allocation4]  }
 0x20e   :  { %100 = dma.smem_to_hbm %s133_s5, 16, %s190_s4, [#allocation5]  }
 0x20f   :  { %129 = dma.done.wait [#allocation5], 16  }
 0x210   :  { %130 = vsyncadd [#allocation5], 4294967280 }
 0x211   :  { %104 = sfence }
 0x212   :  { %105 = vsyncpa [#allocation5], 1 }

</bundles_post_ra>
